<compile_context>
chip_gen: v5e
topology: v5e:2x2
jax: 0.10.0
libtpu: 0.0.40
codegen_flags: <defaults>
</compile_context>

<pallas_src>
import functools
import math

import numpy as np
import jax
import jax.numpy as jnp
from jax.experimental import pallas as pl
from jax.experimental.pallas import tpu as pltpu


# --------------------------------------------------------------------------- #
# Kernel: pure matmul + bias epilogue.  All masking is precomputed outside.
# --------------------------------------------------------------------------- #
def _matmul_bias_kernel(x_ref, wt_ref, b_ref, o_ref):
    """o = x @ W_eff^T + b.

    x_ref : (tm, H)  bf16   -- streamed per grid step
    wt_ref: (H, H)   bf16   -- W_eff^T, VMEM-resident across the whole grid
    b_ref : (1, H)   f32    -- VMEM-resident across the whole grid
    o_ref : (tm, H)  f32
    """
    o_ref[...] = (
        jnp.dot(x_ref[...], wt_ref[...], preferred_element_type=jnp.float32)
        + b_ref[...]
    )


# --------------------------------------------------------------------------- #
# One-time (per weight update) parameter preparation -- NOT in the hot path.
# --------------------------------------------------------------------------- #
def prepare_effective_weight(weight, mask, bias, *, apply_ei_mask=True):
    """Precompute bf16 W_eff^T and (1,H) bias once, outside the per-call path.

    apply_ei_mask=True  -> is_EI == 'EI'  : W_eff = |W| * mask
    apply_ei_mask=False -> is_EI == 'EIno': W_eff = W (still bf16 MXU operand;
        intentional precision trade-off, matching the EI path's operand dtype).
    """
    if apply_ei_mask:
        w_eff = jnp.abs(weight) * mask
    else:
        w_eff = weight
    w_eff_t = w_eff.T.astype(jnp.bfloat16)          # (H_in, H_out)
    bias2d = bias.reshape(1, -1).astype(jnp.float32)  # lane-dense (1, H)
    return w_eff_t, bias2d


# --------------------------------------------------------------------------- #
# Fused apply: one pallas_call for ANY leading (time/batch) extent.
# --------------------------------------------------------------------------- #
@jax.jit
def ei_rec_linear_apply(x, w_eff_t, bias2d):
    """y = F.linear(x, W_eff, bias) for x of shape (..., H).

    All leading dims are flattened into a row axis M and tiled with grid
    (M/tm,); the weight/bias blocks map to (0, 0) every step, so they are
    DMA'd once and stay resident in VMEM while x/y tiles stream through.
    """
    h_in, h_out = w_eff_t.shape
    lead_shape = x.shape[:-1]

    # Wrapper-side operand prep (outside the kernel body): flatten + bf16 cast.
    x2d = x.reshape(-1, h_in).astype(jnp.bfloat16)
    m = x2d.shape[0]

    tm_cap = 256                                    # up to 256 MXU rows per step
    if m <= tm_cap:
        tm, m_pad = m, m                            # single block: full-dim OK
    else:
        tm = tm_cap
        m_pad = ((m + tm - 1) // tm) * tm
        if m_pad != m:
            x2d = jnp.pad(x2d, ((0, m_pad - m), (0, 0)))

    grid = (m_pad // tm,)

    out = pl.pallas_call(
        _matmul_bias_kernel,
        out_shape=jax.ShapeDtypeStruct((m_pad, h_out), jnp.float32),
        grid=grid,
        in_specs=[
            pl.BlockSpec((tm, h_in), lambda i: (i, 0)),      # x tile (streamed)
            pl.BlockSpec((h_in, h_out), lambda i: (0, 0)),   # W_eff^T (resident)
            pl.BlockSpec((1, h_out), lambda i: (0, 0)),      # bias    (resident)
        ],
        out_specs=pl.BlockSpec((tm, h_out), lambda i: (i, 0)),
        compiler_params=pltpu.CompilerParams(
            dimension_semantics=("parallel",),
        ),
    )(x2d, w_eff_t, bias2d)

    return out[:m].reshape(lead_shape + (h_out,))


# --------------------------------------------------------------------------- #
# Deterministic parameter / mask construction mirroring EIRecLinear.__init__.
# --------------------------------------------------------------------------- #
def build_params(key, hp):
    n_rnn, n_md = hp["n_rnn"], hp["n_md"]
    hidden_size = n_rnn + n_md
    i_size_one = int(n_rnn * (1.0 - hp["e_prop"]) / 3)
    i_size = 3 * i_size_one
    pc = n_rnn - i_size
    e_size = pc + n_md

    # Default mask ('type1'): +1 for first e_size columns, -1 for last i_size, diag=0.
    mask = np.tile([1.0] * e_size + [-1.0] * i_size, (hidden_size, 1)).astype(np.float32)
    np.fill_diagonal(mask, 0.0)

    k_w, k_b = jax.random.split(key)

    # init_hh == 'init1': 0.999 on diagonal, N(0, initial_std/sqrt(H)) off-diagonal.
    eye = jnp.eye(hidden_size, dtype=jnp.float32)
    non_diag = jax.random.normal(k_w, (hidden_size, hidden_size), dtype=jnp.float32) * (
        hp["initial_std"] / math.sqrt(hidden_size)
    )
    weight = eye * 0.999 + (1.0 - eye) * non_diag

    # Bias: uniform(-1/sqrt(fan_in), 1/sqrt(fan_in)).
    bound = 1.0 / math.sqrt(hidden_size)
    bias = jax.random.uniform(
        k_b, (hidden_size,), dtype=jnp.float32, minval=-bound, maxval=bound
    )

    return weight, jnp.asarray(mask), bias, e_size


if __name__ == "__main__":
    hp = {
        "n_rnn": 96,
        "n_md": 32,
        "e_prop": 0.75,          # i_size_one=8, i_size=24, pc=72, e_size=104, H=128
        "initial_std": 0.3,
        "init_hh": "init1",
        "is_EI": "EI",
        "mask_type": "type1",
        "mask_test": "no",
        "use_reset": "no",
    }
    hidden_size = hp["n_rnn"] + hp["n_md"]
    batch = 8

    key = jax.random.PRNGKey(0)
    k_params, k_x, k_xs = jax.random.split(key, 3)
    weight, mask, bias, e_size = build_params(k_params, hp)

    # One-time weight prep (per weight update), outside the per-call path.
    apply_ei = hp["is_EI"] == "EI"
    w_eff_t, bias2d = prepare_effective_weight(weight, mask, bias,
                                               apply_ei_mask=apply_ei)

    # --- Single-step forward: x (B, H), matches module.forward exactly. ------
    x = jax.random.normal(k_x, (batch, hidden_size), dtype=jnp.float32)
    y = jax.block_until_ready(ei_rec_linear_apply(x, w_eff_t, bias2d))

    w_eff = jnp.abs(weight) * mask
    y_ref_f32 = x @ w_eff.T + bias
    y_ref_bf16 = (
        jnp.dot(x.astype(jnp.bfloat16), w_eff.astype(jnp.bfloat16).T,
                preferred_element_type=jnp.float32) + bias
    )
    assert jnp.allclose(y, y_ref_bf16, atol=1e-3, rtol=1e-3), \
        "single-step mismatch vs bf16-operand reference"
    assert jnp.allclose(y, y_ref_f32, atol=5e-2, rtol=5e-2), \
        "single-step mismatch vs f32 reference"

    # --- Fused sequence forward: x (T, B, H), one pallas_call, weight resident.
    T = 40  # 40*8 = 320 rows -> exercises the tiled (tm=256) + padded path
    x_seq = jax.random.normal(k_xs, (T, batch, hidden_size), dtype=jnp.float32)
    y_seq = jax.block_until_ready(ei_rec_linear_apply(x_seq, w_eff_t, bias2d))

    y_seq_ref = (
        jnp.dot(x_seq.reshape(-1, hidden_size).astype(jnp.bfloat16),
                w_eff.astype(jnp.bfloat16).T,
                preferred_element_type=jnp.float32) + bias
    ).reshape(T, batch, hidden_size)
    assert y_seq.shape == (T, batch, hidden_size)
    assert jnp.allclose(y_seq, y_seq_ref, atol=1e-3, rtol=1e-3), \
        "sequence mismatch vs bf16-operand reference"

    print("KERNEL_OK")
</pallas_src>

<mosaic_0001>
module attributes {stable_mosaic.version = 11 : i64} {
  func.func @_matmul_bias_kernel(%arg0: i32, %arg1: memref<8x128xbf16, #tpu.memory_space<vmem>>, %arg2: memref<128x128xbf16, #tpu.memory_space<vmem>>, %arg3: memref<1x128xf32, #tpu.memory_space<vmem>>, %arg4: memref<8x128xf32, #tpu.memory_space<vmem>>) attributes {dimension_semantics = [#tpu.dimension_semantics<parallel>], iteration_bounds = array<i64: 1>, scalar_prefetch = 0 : i64, scratch_operands = 0 : i64, tpu.core_type = #tpu.core_type<tc>, window_params = [{transform_indices = @transform_0, window_bounds = array<i64: 8, 128>}, {pipeline_mode = #tpu.pipeline_mode<synchronous>, transform_indices = @transform_1, window_bounds = array<i64: 128, 128>}, {pipeline_mode = #tpu.pipeline_mode<synchronous>, transform_indices = @transform_2, window_bounds = array<i64: 1, 128>}, {transform_indices = @transform_3, window_bounds = array<i64: 8, 128>}]} {
    %c0 = arith.constant 0 : index
    %c0_0 = arith.constant 0 : index
    %0 = vector.load %arg1[%c0, %c0_0] : memref<8x128xbf16, #tpu.memory_space<vmem>>, vector<8x128xbf16>
    %c0_1 = arith.constant 0 : index
    %c0_2 = arith.constant 0 : index
    %1 = vector.load %arg2[%c0_1, %c0_2] : memref<128x128xbf16, #tpu.memory_space<vmem>>, vector<128x128xbf16>
    %cst = arith.constant dense<0.000000e+00> : vector<8x128xf32>
    %2 = tpu.matmul %0, %1, %cst {dimension_numbers = #tpu.dot_dimension_numbers<[1], [0], [0], [1], [0, 0, 1, 1], [], []>} : vector<8x128xbf16>, vector<128x128xbf16>, vector<8x128xf32> -> vector<8x128xf32>
    %c0_3 = arith.constant 0 : index
    %c0_4 = arith.constant 0 : index
    %3 = vector.load %arg3[%c0_3, %c0_4] : memref<1x128xf32, #tpu.memory_space<vmem>>, vector<1x128xf32>
    %4 = vector.broadcast %3 : vector<1x128xf32> to vector<8x128xf32>
    %5 = arith.addf %2, %4 : vector<8x128xf32>
    %c0_5 = arith.constant 0 : index
    %c0_6 = arith.constant 0 : index
    %6 = vector.load %arg4[%c0_5, %c0_6] : memref<8x128xf32, #tpu.memory_space<vmem>>, vector<8x128xf32>
    tpu.vector_store %arg4[%c0_5, %c0_6], %5 {strides = array<i32>} : memref<8x128xf32, #tpu.memory_space<vmem>>, vector<8x128xf32>,
    return
  }
  func.func @transform_0(%arg0: i32) -> (i32, i32) {
    %c0_i32 = arith.constant 0 : i32
    %c0_i32_0 = arith.constant 0 : i32
    return %arg0, %c0_i32 : i32, i32
  }
  func.func @transform_1(%arg0: i32) -> (i32, i32) {
    %c0_i32 = arith.constant 0 : i32
    %c0_i32_0 = arith.constant 0 : i32
    %c0_i32_1 = arith.constant 0 : i32
    return %c0_i32, %c0_i32_0 : i32, i32
  }
  func.func @transform_2(%arg0: i32) -> (i32, i32) {
    %c0_i32 = arith.constant 0 : i32
    %c0_i32_0 = arith.constant 0 : i32
    %c0_i32_1 = arith.constant 0 : i32
    return %c0_i32, %c0_i32_0 : i32, i32
  }
  func.func @transform_3(%arg0: i32) -> (i32, i32) {
    %c0_i32 = arith.constant 0 : i32
    %c0_i32_0 = arith.constant 0 : i32
    return %arg0, %c0_i32 : i32, i32
  }
}

</mosaic_0001>

<bundles_post_ra>
// kernel: ei_rec_linear_apply.1
= control target key start
LH: loop header
LB: loop body
LE: loop exit
PB: predicated region body
PF: predicated region fallthrough
CT: control target
= control target key end

     0   :  { %8 = vsyncpa [#allocation3], 0  ;;  %s264_s0 = inlined_call_operand.vmem [shape: bf16[8,128], index: 0, kind: input, shape index: {}]   ;;  %s265_s1 = inlined_call_operand.hbm [shape: bf16[128,128], index: 1, kind: input, shape index: {}]   ;;  %s266_s2 = inlined_call_operand.vmem [shape: f32[1,128], index: 2, kind: input, shape index: {}]   ;;  %s267_s3 = inlined_call_operand.hbm [shape: f32[8,128], index: 3, kind: output, shape index: {}]  }
   0x1   :  { %9 = vsyncpa [#allocation4], 0  ;;  %s16_s14 = sshll.u32 %s265_s1, 4  ;;  %s228_s15 = smov [#allocation2]   ;;  %s17_s14 = int_to_ptr.hbm [resolvable:$true] %s16_s14 }
   0x2   :  { %s18_s16 = sshll.u32 %s228_s15, 4  ;;  %s229_s17 = smov 64   ;;  %s19_s16 = int_to_ptr.vmem [resolvable:$true] %s18_s16 }
   0x3   :  { %s230_s18 = smov 4  }
   0x4   :  { %24 = dma.hbm_to_vmem [thread:$0]  %s17_s14, 1024, %s19_s16, [#allocation3], %s229_s17, %s229_s17, %s230_s18  }
   0x5   :  { %224 = dma.done.wait [#allocation3], 1024  }
   0x6   :  { %225 = vsyncadd [#allocation3], 4294966272  ;;  %v170_v0 = vld [vmem:[#allocation2 + $0x38] sm:$0xff]  ;;  %v169_v1 = vld [vmem:[#allocation2 + $0x30] sm:$0xff]  ;;  %s231_s22 = smov [#allocation5]   ;;  %s121_s26 = sshll.u32 %s267_s3, 4  ;;  %s122_s26 = int_to_ptr.hbm [resolvable:$true] %s121_s26 }
   0x7   :  { %100 = vmatpush.bf16.msra.mxu0 %v170_v0  ;;  %v168_v2 = vld [vmem:[#allocation2 + $0x28] sm:$0xff]  ;;  %v167_v3 = vld [vmem:[#allocation2 + $0x20] sm:$0xff]  ;;  %v166_v4 = vld [vmem:[#allocation2 + $0x18] sm:$0xff]  ;;  %s119_s23 = sshll.u32 %s231_s22, 4  ;;  %s120_s23 = int_to_ptr.vmem [resolvable:$true] %s119_s23 }
   0x8   :  { %v165_v5 = vld [vmem:[#allocation2 + $0x10] sm:$0xff]  ;;  %v164_v6 = vld [vmem:[#allocation2 + $0x8] sm:$0xff]  ;;  %v163_v7 = vld [vmem:[#allocation2] sm:$0xff] }
   0x9   :  { %v31_v8 = vld [vmem:[%s264_s0] sm:$0xf] }
   0xa   :  { %v175_v9 = vld [vmem:[%s266_s2] ss:$0 sm:$0xff] }
   0xb   :  { %101 = vmatpush.bf16.msra.mxu0 %v169_v1 }
   0xf   :  { %102 = vmatpush.bf16.msra.mxu0 %v168_v2 }
  0x13   :  { %103 = vmatpush.bf16.msra.mxu0 %v167_v3 }
  0x17   :  { %104 = vmatpush.bf16.msra.mxu0 %v166_v4 }
  0x1b   :  { %105 = vmatpush.bf16.msra.mxu0 %v165_v5 }
  0x1f   :  { %106 = vmatpush.bf16.msra.mxu0 %v164_v6 }
  0x23   :  { %107 = vmatpush.bf16.msra.mxu0 %v163_v7 }
  0x26   :  { %108 = vmatmul.bf16.vlgmr.msra.gmra.mxu0 %v31_v8 }
  0xa3   :  { %v109_v10 = vpop.f32.mrf.mxu0 }
  0xa4   :  { %v110_v11 = vadd.f32 %v175_v9, %v109_v10 }
  0xa6   :  { %113 = vst [vmem:[#allocation5] sm:$0xff] %v110_v11 }
  0xa7   :  { %124 = dma.vmem_to_hbm [thread:$0]  %s120_s23, 128, %s122_s26, [#allocation4]  }
  0xab   :  { %v111_v12 = vpop.f32.mrf.mxu0 }
  0xac   :  { %226 = dma.done.wait [#allocation4], 128  }
  0xad   :  { %227 = vsyncadd [#allocation4], 4294967168 }
  0xae   :  { %129 = vsyncpa [#allocation3], 1 }
  0xaf   :  { %130 = vsyncpa [#allocation4], 1 }

</bundles_post_ra>
